<compile_context>
chip_gen: v6e
topology: v6e:2x2x1
jax: 0.10.0
libtpu: 0.0.40
codegen_flags: <defaults>
</compile_context>

<pallas_src>
import jax
import jax.numpy as jnp
from jax.experimental import pallas as pl
from jax.experimental.pallas import tpu as pltpu

# Module-consistent sizes (feature_num + n_actions = fc1 input dim).
FEATURE_NUM = 56
N_ACTIONS = 8
IN_DIM = FEATURE_NUM + N_ACTIONS   # 64
HIDDEN = 512                       # hard-coded in the PyTorch module
OUT_DIM = 1
BATCH = 8


def critic_kernel(s_ref, a_ref, w1s_ref, w1a_ref, b1_ref,
                  w2_ref, b2_ref, w3_ref, b3_ref, q_ref):
    # ---- fc1: split-K matmul fuses torch.cat([state, action], dim=1). ----
    s = s_ref[...].astype(jnp.bfloat16)                                 # (B, 56)
    a = a_ref[...].astype(jnp.bfloat16)                                 # (B, 8)
    h1 = jnp.dot(s, w1s_ref[...], preferred_element_type=jnp.float32)   # (B, H)
    h1 = h1 + jnp.dot(a, w1a_ref[...], preferred_element_type=jnp.float32)
    h1 = jnp.maximum(h1 + b1_ref[...], 0.0)                             # relu, f32 VPU

    # ---- fc2: bf16 MXU matmul with f32 accumulation. ----
    h2 = jnp.dot(h1.astype(jnp.bfloat16), w2_ref[...],
                 preferred_element_type=jnp.float32)                    # (B, H)
    h2 = jnp.maximum(h2 + b2_ref[...], 0.0)

    # ---- q_out (width 1): VPU multiply + lane reduce (no MXU push/pop). ----
    q = jnp.sum(h2 * w3_ref[...], axis=-1, keepdims=True) + b3_ref[...]  # (B, 1)
    q_ref[...] = q.astype(q_ref.dtype)


def critic_forward(state, action, params):
    """state: (B, FEATURE_NUM) f32, action: (B, N_ACTIONS) f32 -> q: (B, 1) f32."""
    w1s, w1a, b1, w2, b2, w3, b3 = params
    b = state.shape[0]

    args = (state, action, w1s, w1a, b1, w2, b2, w3, b3)
    bytes_accessed = sum(int(x.size) * x.dtype.itemsize for x in args) \
        + b * OUT_DIM * 4
    cost = pl.CostEstimate(
        flops=2 * b * (IN_DIM * HIDDEN + HIDDEN * HIDDEN + HIDDEN),
        transcendentals=0,
        bytes_accessed=bytes_accessed,
    )

    vmem = pl.BlockSpec(memory_space=pltpu.MemorySpace.VMEM)
    return pl.pallas_call(
        critic_kernel,
        out_shape=jax.ShapeDtypeStruct((b, OUT_DIM), jnp.float32),
        in_specs=[vmem] * len(args),
        out_specs=vmem,
        cost_estimate=cost,
    )(*args)


def init_params(key):
    """Deterministic synthetic parameters (shapes from Critic.__init__).

    Weights are stored transposed vs PyTorch ((in, out)); W1 is pre-split into
    its state / action halves so the kernel can fuse torch.cat as split-K.
    Matmul weights are stored bf16 (halves weight DMA); biases and w3 (VPU
    path) stay f32.
    """
    ks = jax.random.split(key, 6)
    scale1 = 1.0 / jnp.sqrt(IN_DIM)
    scale2 = 1.0 / jnp.sqrt(HIDDEN)
    w1 = jax.random.uniform(ks[0], (IN_DIM, HIDDEN), jnp.float32, -scale1, scale1)
    b1 = jax.random.uniform(ks[1], (1, HIDDEN), jnp.float32, -scale1, scale1)
    w2 = jax.random.uniform(ks[2], (HIDDEN, HIDDEN), jnp.float32, -scale2, scale2)
    b2 = jax.random.uniform(ks[3], (1, HIDDEN), jnp.float32, -scale2, scale2)
    w3 = jax.random.uniform(ks[4], (1, HIDDEN), jnp.float32, -scale2, scale2)
    b3 = jax.random.uniform(ks[5], (1, OUT_DIM), jnp.float32, -scale2, scale2)

    w1s = w1[:FEATURE_NUM].astype(jnp.bfloat16)   # (56, 512)
    w1a = w1[FEATURE_NUM:].astype(jnp.bfloat16)   # (8, 512)
    w2b = w2.astype(jnp.bfloat16)                 # (512, 512)
    return (w1s, w1a, b1, w2b, b2, w3, b3)


def critic_reference(state, action, params):
    """Pure-JAX reference applying the same bf16 weight/activation quantization."""
    w1s, w1a, b1, w2, b2, w3, b3 = params
    x = jnp.concatenate([state, action], axis=1)
    x = x.astype(jnp.bfloat16).astype(jnp.float32)
    w1 = jnp.concatenate([w1s, w1a], axis=0).astype(jnp.float32)
    h1 = jnp.maximum(x @ w1 + b1, 0.0)
    h2 = jnp.maximum(
        h1.astype(jnp.bfloat16).astype(jnp.float32) @ w2.astype(jnp.float32) + b2,
        0.0)
    return jnp.sum(h2 * w3, axis=-1, keepdims=True) + b3


if __name__ == "__main__":
    key = jax.random.PRNGKey(0)
    k_state, k_action, k_params = jax.random.split(key, 3)

    state = jax.random.normal(k_state, (BATCH, FEATURE_NUM), jnp.float32)
    action = jax.random.normal(k_action, (BATCH, N_ACTIONS), jnp.float32)
    params = init_params(k_params)

    q = critic_forward(state, action, params)
    q = jax.block_until_ready(q)

    q_ref = critic_reference(state, action, params)
    assert q.shape == (BATCH, OUT_DIM)
    assert jnp.allclose(q, q_ref, atol=2e-3, rtol=2e-3), (
        f"max abs diff = {jnp.max(jnp.abs(q - q_ref))}")

    print("KERNEL_OK")
</pallas_src>

<mosaic_0001>
module attributes {stable_mosaic.version = 11 : i64} {
  func.func @critic_kernel(%arg0: memref<8x56xf32, #tpu.memory_space<vmem>>, %arg1: memref<8x8xf32, #tpu.memory_space<vmem>>, %arg2: memref<56x512xbf16, #tpu.memory_space<vmem>>, %arg3: memref<8x512xbf16, #tpu.memory_space<vmem>>, %arg4: memref<1x512xf32, #tpu.memory_space<vmem>>, %arg5: memref<512x512xbf16, #tpu.memory_space<vmem>>, %arg6: memref<1x512xf32, #tpu.memory_space<vmem>>, %arg7: memref<1x512xf32, #tpu.memory_space<vmem>>, %arg8: memref<1x1xf32, #tpu.memory_space<vmem>>, %arg9: memref<8x1xf32, #tpu.memory_space<vmem>>) attributes {dimension_semantics = [], scalar_prefetch = 0 : i64, scratch_operands = 0 : i64, tpu.core_type = #tpu.core_type<tc>} {
    %c0 = arith.constant 0 : index
    %c0_0 = arith.constant 0 : index
    %0 = vector.load %arg0[%c0, %c0_0] : memref<8x56xf32, #tpu.memory_space<vmem>>, vector<8x56xf32>
    %1 = arith.truncf %0 : vector<8x56xf32> to vector<8x56xbf16>
    %c0_1 = arith.constant 0 : index
    %c0_2 = arith.constant 0 : index
    %2 = vector.load %arg1[%c0_1, %c0_2] : memref<8x8xf32, #tpu.memory_space<vmem>>, vector<8x8xf32>
    %3 = arith.truncf %2 : vector<8x8xf32> to vector<8x8xbf16>
    %c0_3 = arith.constant 0 : index
    %c0_4 = arith.constant 0 : index
    %4 = vector.load %arg2[%c0_3, %c0_4] : memref<56x512xbf16, #tpu.memory_space<vmem>>, vector<56x512xbf16>
    %cst = arith.constant dense<0.000000e+00> : vector<8x512xf32>
    %5 = tpu.matmul %1, %4, %cst {dimension_numbers = #tpu.dot_dimension_numbers<[1], [0], [0], [1], [0, 0, 1, 1], [], []>} : vector<8x56xbf16>, vector<56x512xbf16>, vector<8x512xf32> -> vector<8x512xf32>
    %c0_5 = arith.constant 0 : index
    %c0_6 = arith.constant 0 : index
    %6 = vector.load %arg3[%c0_5, %c0_6] : memref<8x512xbf16, #tpu.memory_space<vmem>>, vector<8x512xbf16>
    %cst_7 = arith.constant dense<0.000000e+00> : vector<8x512xf32>
    %7 = tpu.matmul %3, %6, %cst_7 {dimension_numbers = #tpu.dot_dimension_numbers<[1], [0], [0], [1], [0, 0, 1, 1], [], []>} : vector<8x8xbf16>, vector<8x512xbf16>, vector<8x512xf32> -> vector<8x512xf32>
    %8 = arith.addf %5, %7 : vector<8x512xf32>
    %c0_8 = arith.constant 0 : index
    %c0_9 = arith.constant 0 : index
    %9 = vector.load %arg4[%c0_8, %c0_9] : memref<1x512xf32, #tpu.memory_space<vmem>>, vector<1x512xf32>
    %10 = vector.broadcast %9 : vector<1x512xf32> to vector<8x512xf32>
    %11 = arith.addf %8, %10 : vector<8x512xf32>
    %cst_10 = arith.constant 0.000000e+00 : f32
    %12 = vector.broadcast %cst_10 : f32 to vector<8x512xf32>
    %13 = arith.maximumf %11, %12 : vector<8x512xf32>
    %14 = arith.truncf %13 : vector<8x512xf32> to vector<8x512xbf16>
    %c0_11 = arith.constant 0 : index
    %c0_12 = arith.constant 0 : index
    %15 = vector.load %arg5[%c0_11, %c0_12] : memref<512x512xbf16, #tpu.memory_space<vmem>>, vector<512x512xbf16>
    %cst_13 = arith.constant dense<0.000000e+00> : vector<8x512xf32>
    %16 = tpu.matmul %14, %15, %cst_13 {dimension_numbers = #tpu.dot_dimension_numbers<[1], [0], [0], [1], [0, 0, 1, 1], [], []>} : vector<8x512xbf16>, vector<512x512xbf16>, vector<8x512xf32> -> vector<8x512xf32>
    %c0_14 = arith.constant 0 : index
    %c0_15 = arith.constant 0 : index
    %17 = vector.load %arg6[%c0_14, %c0_15] : memref<1x512xf32, #tpu.memory_space<vmem>>, vector<1x512xf32>
    %18 = vector.broadcast %17 : vector<1x512xf32> to vector<8x512xf32>
    %19 = arith.addf %16, %18 : vector<8x512xf32>
    %cst_16 = arith.constant 0.000000e+00 : f32
    %20 = vector.broadcast %cst_16 : f32 to vector<8x512xf32>
    %21 = arith.maximumf %19, %20 : vector<8x512xf32>
    %c0_17 = arith.constant 0 : index
    %c0_18 = arith.constant 0 : index
    %22 = vector.load %arg7[%c0_17, %c0_18] : memref<1x512xf32, #tpu.memory_space<vmem>>, vector<1x512xf32>
    %23 = vector.broadcast %22 : vector<1x512xf32> to vector<8x512xf32>
    %24 = arith.mulf %21, %23 : vector<8x512xf32>
    %cst_19 = arith.constant dense<0.000000e+00> : vector<8xf32>
    %25 = vector.multi_reduction <add>, %24, %cst_19 [1] : vector<8x512xf32> to vector<8xf32>
    %26 = vector.shape_cast %25 : vector<8xf32> to vector<8x1xf32>
    %c0_20 = arith.constant 0 : index
    %c0_21 = arith.constant 0 : index
    %27 = vector.load %arg8[%c0_20, %c0_21] : memref<1x1xf32, #tpu.memory_space<vmem>>, vector<1x1xf32>
    %28 = vector.broadcast %27 : vector<1x1xf32> to vector<8x1xf32>
    %29 = arith.addf %26, %28 : vector<8x1xf32>
    %c0_22 = arith.constant 0 : index
    %c0_23 = arith.constant 0 : index
    %30 = vector.load %arg9[%c0_22, %c0_23] : memref<8x1xf32, #tpu.memory_space<vmem>>, vector<8x1xf32>
    tpu.vector_store %arg9[%c0_22, %c0_23], %29 {strides = array<i32>} : memref<8x1xf32, #tpu.memory_space<vmem>>, vector<8x1xf32>,
    return
  }
}

</mosaic_0001>

<bundles_post_ra>
// kernel: tpu_custom_call.1
= control target key start
LH: loop header
LB: loop body
LE: loop exit
PB: predicated region body
PF: predicated region fallthrough
CT: control target
= control target key end

     0   :  { %s2047_s0 = inlined_call_operand.hbm [shape: f32[8,56], index: 0, kind: input, shape index: {}]   ;;  %s2048_s1 = inlined_call_operand.hbm [shape: f32[8,8], index: 1, kind: input, shape index: {}]   ;;  %s2049_s2 = inlined_call_operand.hbm [shape: bf16[56,512], index: 2, kind: input, shape index: {}]   ;;  %s2050_s3 = inlined_call_operand.hbm [shape: bf16[8,512], index: 3, kind: input, shape index: {}]   ;;  %s2051_s4 = inlined_call_operand.vmem [shape: f32[1,512], index: 4, kind: input, shape index: {}]   ;;  %s2052_s5 = inlined_call_operand.hbm [shape: bf16[512,512], index: 5, kind: input, shape index: {}]   ;;  %s2053_s6 = inlined_call_operand.vmem [shape: f32[1,512], index: 6, kind: input, shape index: {}]   ;;  %s2054_s7 = inlined_call_operand.vmem [shape: f32[1,512], index: 7, kind: input, shape index: {}]   ;;  %s2055_s8 = inlined_call_operand.<no memory space> [shape: f32[1,1], index: 8, kind: input, shape index: {}]   ;;  %s2056_s9 = inlined_call_operand.vmem [shape: f32[8,1], index: 9, kind: output, shape index: {}]  }
   0x1   :  { %v14_v0 = vstv %s2055_s8 }
   0x2   :  { %15 = vst [vmem:[#allocation2] sm:$0x1] %v14_v0 }
   0x3   :  { %16 = vsyncpa [#allocation4], 0 }
   0x4   :  { %17 = vsyncpa [#allocation6], 0 }
   0x5   :  { %18 = vsyncpa [#allocation9], 0  ;;  %s1923_s11 = smov [#allocation5]   ;;  %s1924_s13 = smov [#allocation8]  }
   0x6   :  { %s35_s12 = sshll.u32 %s1923_s11, 4  ;;  %s57_s14 = sshll.u32 %s1924_s13, 4  ;;  %s36_s12 = int_to_ptr.vmem [resolvable:$true] %s35_s12  ;;  %s58_s14 = int_to_ptr.vmem [resolvable:$true] %s57_s14 }
   0x7   :  { %s1825_s15 = scalar_lea.vmem %s36_s12, 128  ;;  %p1830_p1 = scmp.lt.s32.totalorder %s36_s12, %s36_s12 }
   0x8   :  { %p1826_p0 = scmp.ne.s32.totalorder %s36_s12, %s1825_s15  ;;  %p1831_p2 = scmp.lt.s32.totalorder %s1825_s15, %s1825_s15 }
   0xa   :  { %p1832_p3 = por %p1831_p2, %p1830_p1 }
   0xc   :  { %p1833_p4 = pnand %p1832_p3, %p1826_p0 }
   0xe   :  { %1836 = shalt.err (!%p1833_p4)
}
   0xf   :  { %38 = dma.hbm_to_vmem [thread:$0]  %s2048_s1, 128, %s36_s12, [#allocation6]  }
  0x10   :  { %s1845_s8 = scalar_lea.vmem %s58_s14, 256  ;;  %p1850_p6 = scmp.lt.s32.totalorder %s58_s14, %s58_s14 }
  0x11   :  { %p1846_p5 = scmp.ne.s32.totalorder %s58_s14, %s1845_s8  ;;  %p1851_p7 = scmp.lt.s32.totalorder %s1845_s8, %s1845_s8 }
  0x13   :  { %p1852_p8 = por %p1851_p7, %p1850_p6 }
  0x15   :  { %p1853_p9 = pnand %p1852_p8, %p1846_p5 }
  0x17   :  { %1856 = shalt.err (!%p1853_p9)
}
  0x18   :  { %60 = dma.hbm_to_vmem [thread:$0]  %s2050_s3, 256, %s58_s14, [#allocation9]  }
  0x19   :  { %s1925_s20 = smov [#allocation3]   ;;  %s1926_s22 = smov [#allocation7]  }
  0x1a   :  { %s25_s21 = sshll.u32 %s1925_s20, 4  ;;  %s44_s23 = sshll.u32 %s1926_s22, 4  ;;  %s26_s21 = int_to_ptr.vmem [resolvable:$true] %s25_s21  ;;  %s45_s23 = int_to_ptr.vmem [resolvable:$true] %s44_s23 }
  0x1b   :  { %s1865_s24 = scalar_lea.vmem %s26_s21, 128  ;;  %p1870_p11 = scmp.lt.s32.totalorder %s26_s21, %s26_s21 }
  0x1c   :  { %p1866_p10 = scmp.ne.s32.totalorder %s26_s21, %s1865_s24  ;;  %p1871_p12 = scmp.lt.s32.totalorder %s1865_s24, %s1865_s24 }
  0x1e   :  { %p1872_p13 = por %p1871_p12, %p1870_p11 }
  0x20   :  { %p1873_p0 = pnand %p1872_p13, %p1866_p10 }
  0x22   :  { %1876 = shalt.err (!%p1873_p0)
}
  0x23   :  { %28 = dma.hbm_to_vmem [thread:$0]  %s2047_s0, 128, %s26_s21, [#allocation4]  }
  0x24   :  { %s1885_s26 = scalar_lea.vmem %s45_s23, 1792  ;;  %p1890_p2 = scmp.lt.s32.totalorder %s45_s23, %s45_s23 }
  0x25   :  { %p1886_p1 = scmp.ne.s32.totalorder %s45_s23, %s1885_s26  ;;  %p1891_p3 = scmp.lt.s32.totalorder %s1885_s26, %s1885_s26 }
  0x27   :  { %p1892_p4 = por %p1891_p3, %p1890_p2 }
  0x29   :  { %p1893_p5 = pnand %p1892_p4, %p1886_p1 }
  0x2b   :  { %1896 = shalt.err (!%p1893_p5)
}
  0x2c   :  { %s1927_s3 = smov 256   ;;  %s1928_s27 = smov 16  }
  0x2d   :  { %50 = dma.hbm_to_vmem [thread:$0]  %s2049_s2, 1792, %s45_s23, [#allocation6], %s1927_s3, %s1927_s3, %s1928_s27  }
  0x2e   :  { %s1929_s30 = smov [#allocation10]  }
  0x2f   :  { %s68_s10 = sshll.u32 %s1929_s30, 4  ;;  %s69_s10 = int_to_ptr.vmem [resolvable:$true] %s68_s10 }
  0x30   :  { %s1905_s11 = scalar_lea.vmem %s69_s10, 16384  ;;  %p1910_p7 = scmp.lt.s32.totalorder %s69_s10, %s69_s10 }
  0x31   :  { %p1906_p6 = scmp.ne.s32.totalorder %s69_s10, %s1905_s11  ;;  %p1911_p8 = scmp.lt.s32.totalorder %s1905_s11, %s1905_s11 }
  0x33   :  { %p1912_p9 = por %p1911_p8, %p1910_p7 }
  0x35   :  { %p1913_p10 = pnand %p1912_p9, %p1906_p6 }
  0x37   :  { %1916 = shalt.err (!%p1913_p10)
}
  0x38   :  { %74 = dma.hbm_to_vmem [thread:$0]  %s2052_s5, 16384, %s69_s10, [#allocation9], %s1927_s3, %s1927_s3, %s1928_s27  }
  0x39   :  { %1917 = dma.done.wait [#allocation4], 128  }
  0x3a   :  { %1918 = vsyncadd [#allocation4], 4294967168 }
  0x3b   :  { %1919 = dma.done.wait [#allocation6], 1920  }
  0x3c   :  { %1920 = vsyncadd [#allocation6], 4294965376 }
  0x3d   :  { %1921 = dma.done.wait [#allocation9], 16640  }
  0x3e   :  { %1922 = vsyncadd [#allocation9], 4294950656  ;;  %v1930_v1 = vmov 0   ;;  %v115_v2 = vld [vmem:[#allocation8] sm:$0xff]  ;;  %vm131_vm0 = vcmask 1043456   ;;  %v116_v3 = vld [vmem:[#allocation8 + $0x8] sm:$0xff] }
  0x3f   :  { %176 = vmatprep.mubr.bf16.mxu0 %v1930_v1  ;;  %217 = vmatprep.mubr.bf16.mxu1 %v1930_v1  ;;  %v99_v4 = vld [vmem:[#allocation5] sm:$0xff]  ;;  %v1435_v5 = vcombine.high %v115_v2, %v115_v2  ;;  %v1437_v6 = vcombine.high %v116_v3, %v116_v3  ;;  %v1434_v7 = vcombine.low %v115_v2, %v115_v2  ;;  %v113_v9 = vld [vmem:[#allocation7 + $0x60] sm:$0xff]  ;;  %v114_v10 = vld [vmem:[#allocation7 + $0x68] sm:$0xff]  ;;  %vm127_vm1 = vcmask 64512  }
  0x40   :  { %v1436_v8 = vcombine.low %v116_v3, %v116_v3  ;;  %v1455_v11 = vcombine.high %v113_v9, %v113_v9  ;;  %v1457_v12 = vcombine.high %v114_v10, %v114_v10  ;;  %v1454_v13 = vcombine.low %v113_v9, %v113_v9  ;;  %v1609_v18 = vld [vmem:[#allocation7 + $0x44] ss:$16 sps:$4 sm:$0xff]   ;;  %v1612_v21 = vld [vmem:[#allocation7 + $0x4c] ss:$16 sps:$4 sm:$0xff]   ;;  %v1607_v22 = vld [vmem:[#allocation7 + $0x40] ss:$16 sps:$4 sm:$0xff]  }
  0x41   :  { %1438 = vmatprep.subr.msk.bf16.mxu0 %vm131_vm0, %v1435_v5  ;;  %1440 = vmatprep.subr.msk.bf16.mxu1 %vm131_vm0, %v1437_v6  ;;  %v133_v14 = vsel %vm131_vm0, %v1434_v7, 0  ;;  %v100_v16 = vpack.c.bf16 %v99_v4, %v99_v4  ;;  %v1456_v17 = vcombine.low %v114_v10, %v114_v10  ;;  %v1610_v23 = vld [vmem:[#allocation7 + $0x48] ss:$16 sps:$4 sm:$0xff]   ;;  %v1615_v24 = vld [vmem:[#allocation7 + $0x24] ss:$16 sps:$4 sm:$0xff]   ;;  %vm296_vm2 = vcmask 457728  }
  0x42   :  { %v139_v15 = vsel %vm131_vm0, %v1436_v8, 0  ;;  %159 = vmatpush1.bf16.msra.mxu0 %v133_v14  ;;  %v301_v19 = vsel %vm131_vm0, %v1454_v13, 0  ;;  %v1618_v25 = vld [vmem:[#allocation7 + $0x2c] ss:$16 sps:$4 sm:$0xff]   ;;  %v1613_v26 = vld [vmem:[#allocation7 + $0x20] ss:$16 sps:$4 sm:$0xff]  }
  0x43   :  { %200 = vmatpush1.bf16.msra.mxu1 %v139_v15  ;;  %1458 = vmatprep.subr.msk.bf16.mxu0 %vm131_vm0, %v1455_v11  ;;  %v307_v20 = vsel %vm131_vm0, %v1456_v17, 0  ;;  %v1616_v27 = vld [vmem:[#allocation7 + $0x28] ss:$16 sps:$4 sm:$0xff]   ;;  %v1621_v28 = vld [vmem:[#allocation7 + $0x4] ss:$16 sps:$4 sm:$0xff]   ;;  %vm1425_vm3 = vcmask 7168  }
  0x44   :  { %1460 = vmatprep.subr.msk.bf16.mxu1 %vm131_vm0, %v1457_v12  ;;  %v1624_v29 = vld [vmem:[#allocation7 + $0xc] ss:$16 sps:$4 sm:$0xff]   ;;  %v1619_v30 = vld [vmem:[#allocation7] ss:$16 sps:$4 sm:$0xff]   ;;  %v1622_v31 = vld [vmem:[#allocation7 + $0x8] ss:$16 sps:$4 sm:$0xff]  }
  0x45   :  { %1439 = vmatmul.mubr.msk.bf16.vlgmr.msra.gmra.mxu0 %vm127_vm1, %v100_v16  ;;  %v97_v32 = vld [vmem:[#allocation3] sm:$0xff] }
  0x46   :  { %1441 = vmatmul.mubr.msk.bf16.vlgmr.msra.gmra.mxu1 %vm127_vm1, %v100_v16  ;;  %321 = vmatpush1.bf16.msra.mxu0 %v301_v19  ;;  %v1627_v33 = vld [vmem:[#allocation10 + $0xe4] ss:$16 sps:$4 sm:$0xff]   ;;  %v98_v35 = vpack.c.bf16 %v97_v32, %v97_v32  ;;  %v1625_v36 = vld [vmem:[#allocation10 + $0xe0] ss:$16 sps:$4 sm:$0xff]  }
  0x47   :  { %362 = vmatpush1.bf16.msra.mxu1 %v307_v20  ;;  %322 = vmatprep.subr.bf16.mxu0 %v1609_v18  ;;  %v1630_v34 = vld [vmem:[#allocation10 + $0x2e4] ss:$16 sps:$4 sm:$0xff]   ;;  %v1628_v37 = vld [vmem:[#allocation10 + $0x2e0] ss:$16 sps:$4 sm:$0xff]  }
  0x48   :  { %363 = vmatprep.subr.bf16.mxu1 %v1612_v21  ;;  %344 = vmatprep.mubr.bf16.mxu0 %v1930_v1  ;;  %v1633_v38 = vld [vmem:[#allocation10 + $0xc4] ss:$16 sps:$4 sm:$0xff]   ;;  %v1631_v40 = vld [vmem:[#allocation10 + $0xc0] ss:$16 sps:$4 sm:$0xff]  }
  0x49   :  { %385 = vmatprep.mubr.bf16.mxu1 %v1930_v1  ;;  %v1636_v39 = vld [vmem:[#allocation10 + $0x2c4] ss:$16 sps:$4 sm:$0xff]   ;;  %v1634_v41 = vld [vmem:[#allocation10 + $0x2c0] ss:$16 sps:$4 sm:$0xff]  }
  0x4a   :  { %323 = vmatpush1.bf16.msra.mxu0 %v1607_v22  ;;  %v1639_v42 = vld [vmem:[#allocation10 + $0xa4] ss:$16 sps:$4 sm:$0xff]   ;;  %v1637_v44 = vld [vmem:[#allocation10 + $0xa0] ss:$16 sps:$4 sm:$0xff]  }
  0x4b   :  { %364 = vmatpush1.bf16.msra.mxu1 %v1610_v23  ;;  %324 = vmatprep.subr.bf16.mxu0 %v1615_v24  ;;  %v1642_v43 = vld [vmem:[#allocation10 + $0x2a4] ss:$16 sps:$4 sm:$0xff]   ;;  %v1640_v45 = vld [vmem:[#allocation10 + $0x2a0] ss:$16 sps:$4 sm:$0xff]  }
  0x4c   :  { %365 = vmatprep.subr.bf16.mxu1 %v1618_v25  ;;  %v1645_v46 = vld [vmem:[#allocation10 + $0x84] ss:$16 sps:$4 sm:$0xff]   ;;  %v1643_v48 = vld [vmem:[#allocation10 + $0x80] ss:$16 sps:$4 sm:$0xff]  }
  0x4d   :  { %v1648_v47 = vld [vmem:[#allocation10 + $0x284] ss:$16 sps:$4 sm:$0xff]   ;;  %v1646_v49 = vld [vmem:[#allocation10 + $0x280] ss:$16 sps:$4 sm:$0xff]  }
  0x4e   :  { %325 = vmatpush1.bf16.msra.mxu0 %v1613_v26  ;;  %v1651_v50 = vld [vmem:[#allocation10 + $0x64] ss:$16 sps:$4 sm:$0xff]   ;;  %v1649_v52 = vld [vmem:[#allocation10 + $0x60] ss:$16 sps:$4 sm:$0xff]  }
  0x4f   :  { %366 = vmatpush1.bf16.msra.mxu1 %v1616_v27  ;;  %326 = vmatprep.subr.bf16.mxu0 %v1621_v28  ;;  %v1654_v51 = vld [vmem:[#allocation10 + $0x264] ss:$16 sps:$4 sm:$0xff]   ;;  %v1652_v53 = vld [vmem:[#allocation10 + $0x260] ss:$16 sps:$4 sm:$0xff]  }
  0x50   :  { %367 = vmatprep.subr.bf16.mxu1 %v1624_v29  ;;  %v1657_v54 = vld [vmem:[#allocation10 + $0x44] ss:$16 sps:$4 sm:$0xff]   ;;  %v1655_v56 = vld [vmem:[#allocation10 + $0x40] ss:$16 sps:$4 sm:$0xff]  }
  0x51   :  { %v1660_v55 = vld [vmem:[#allocation10 + $0x244] ss:$16 sps:$4 sm:$0xff]   ;;  %v1658_v57 = vld [vmem:[#allocation10 + $0x240] ss:$16 sps:$4 sm:$0xff]  }
  0x52   :  { %327 = vmatpush1.bf16.msra.mxu0 %v1619_v30  ;;  %v1663_v58 = vld [vmem:[#allocation10 + $0x24] ss:$16 sps:$4 sm:$0xff]   ;;  %v1661_v60 = vld [vmem:[#allocation10 + $0x20] ss:$16 sps:$4 sm:$0xff]  }
  0x53   :  { %368 = vmatpush1.bf16.msra.mxu1 %v1622_v31  ;;  %1218 = vmatprep.subr.bf16.mxu0 %v1627_v33  ;;  %v1666_v59 = vld [vmem:[#allocation10 + $0x224] ss:$16 sps:$4 sm:$0xff]   ;;  %v1664_v61 = vld [vmem:[#allocation10 + $0x220] ss:$16 sps:$4 sm:$0xff]  }
  0x54   :  { %1259 = vmatprep.subr.bf16.mxu1 %v1630_v34  ;;  %v1669_v62 = vld [vmem:[#allocation10 + $0x4] ss:$16 sps:$4 sm:$0xff]   ;;  %v1667_v0 = vld [vmem:[#allocation10] ss:$16 sps:$4 sm:$0xff]   ;;  %v1723_v34 = vld [vmem:[#allocation10 + $0xec] ss:$16 sps:$4 sm:$0xff]  }
  0x55   :  { %1459 = vmatmul.mubr.msk.bf16.vlgmr.msra.gmra.mxu0 %vm296_vm2, %v98_v35  ;;  %v1672_v63 = vld [vmem:[#allocation10 + $0x204] ss:$16 sps:$4 sm:$0xff]   ;;  %v1670_v1 = vld [vmem:[#allocation10 + $0x200] ss:$16 sps:$4 sm:$0xff]  }
  0x56   :  { %1461 = vmatmul.mubr.msk.bf16.vlgmr.msra.gmra.mxu1 %vm296_vm2, %v98_v35  ;;  %1219 = vmatpush1.bf16.msra.mxu0 %v1625_v36  ;;  %v1675_v2 = vld [vmem:[#allocation10 + $0x1e4] ss:$16 sps:$4 sm:$0xff]   ;;  %v1673_v4 = vld [vmem:[#allocation10 + $0x1e0] ss:$16 sps:$4 sm:$0xff]   ;;  %v1726_v35 = vld [vmem:[#allocation10 + $0x2ec] ss:$16 sps:$4 sm:$0xff]  }
  0x57   :  { %1260 = vmatpush1.bf16.msra.mxu1 %v1628_v37  ;;  %1220 = vmatprep.subr.bf16.mxu0 %v1633_v38  ;;  %v1678_v3 = vld [vmem:[#allocation10 + $0x3e4] ss:$16 sps:$4 sm:$0xff]   ;;  %v1676_v5 = vld [vmem:[#allocation10 + $0x3e0] ss:$16 sps:$4 sm:$0xff]  }
  0x58   :  { %1261 = vmatprep.subr.bf16.mxu1 %v1636_v39  ;;  %v1681_v6 = vld [vmem:[#allocation10 + $0x1c4] ss:$16 sps:$4 sm:$0xff]   ;;  %v1679_v8 = vld [vmem:[#allocation10 + $0x1c0] ss:$16 sps:$4 sm:$0xff]  }
  0x59   :  { %v1684_v7 = vld [vmem:[#allocation10 + $0x3c4] ss:$16 sps:$4 sm:$0xff]   ;;  %v1682_v9 = vld [vmem:[#allocation10 + $0x3c0] ss:$16 sps:$4 sm:$0xff]  }
  0x5a   :  { %1221 = vmatpush1.bf16.msra.mxu0 %v1631_v40  ;;  %v1687_v10 = vld [vmem:[#allocation10 + $0x1a4] ss:$16 sps:$4 sm:$0xff]   ;;  %v1685_v12 = vld [vmem:[#allocation10 + $0x1a0] ss:$16 sps:$4 sm:$0xff]   ;;  %v396_v40 = vlaneseq }
  0x5b   :  { %1262 = vmatpush1.bf16.msra.mxu1 %v1634_v41  ;;  %1222 = vmatprep.subr.bf16.mxu0 %v1639_v42  ;;  %v1690_v11 = vld [vmem:[#allocation10 + $0x3a4] ss:$16 sps:$4 sm:$0xff]   ;;  %v1688_v13 = vld [vmem:[#allocation10 + $0x3a0] ss:$16 sps:$4 sm:$0xff]  }
  0x5c   :  { %1263 = vmatprep.subr.bf16.mxu1 %v1642_v43  ;;  %v1693_v14 = vld [vmem:[#allocation10 + $0x184] ss:$16 sps:$4 sm:$0xff]   ;;  %v1691_v16 = vld [vmem:[#allocation10 + $0x180] ss:$16 sps:$4 sm:$0xff]  }
  0x5d   :  { %v1696_v15 = vld [vmem:[#allocation10 + $0x384] ss:$16 sps:$4 sm:$0xff]   ;;  %v1694_v17 = vld [vmem:[#allocation10 + $0x380] ss:$16 sps:$4 sm:$0xff]  }
  0x5e   :  { %1223 = vmatpush1.bf16.msra.mxu0 %v1637_v44  ;;  %v1699_v18 = vld [vmem:[#allocation10 + $0x164] ss:$16 sps:$4 sm:$0xff]   ;;  %v1697_v20 = vld [vmem:[#allocation10 + $0x160] ss:$16 sps:$4 sm:$0xff]  }
  0x5f   :  { %1264 = vmatpush1.bf16.msra.mxu1 %v1640_v45  ;;  %1224 = vmatprep.subr.bf16.mxu0 %v1645_v46  ;;  %v1702_v19 = vld [vmem:[#allocation10 + $0x364] ss:$16 sps:$4 sm:$0xff]   ;;  %v1700_v21 = vld [vmem:[#allocation10 + $0x360] ss:$16 sps:$4 sm:$0xff]   ;;  %v397_v45 = vshrl.u32 %v396_v40, 7 }
  0x60   :  { %1265 = vmatprep.subr.bf16.mxu1 %v1648_v47  ;;  %v1705_v22 = vld [vmem:[#allocation10 + $0x144] ss:$16 sps:$4 sm:$0xff]   ;;  %v1703_v24 = vld [vmem:[#allocation10 + $0x140] ss:$16 sps:$4 sm:$0xff]   ;;  %v1760_v40 = vld [vmem:[#allocation10 + $0x228] ss:$16 sps:$4 sm:$0xff]  }
  0x61   :  { %v1708_v23 = vld [vmem:[#allocation10 + $0x344] ss:$16 sps:$4 sm:$0xff]   ;;  %v1706_v25 = vld [vmem:[#allocation10 + $0x340] ss:$16 sps:$4 sm:$0xff]   ;;  %v2007_v46 = vsub.s32 0, %v397_v45  ;;  %v2009_v47 = vsub.s32 2, %v397_v45 }
  0x62   :  { %1225 = vmatpush1.bf16.msra.mxu0 %v1643_v48  ;;  %v1711_v26 = vld [vmem:[#allocation10 + $0x124] ss:$16 sps:$4 sm:$0xff]   ;;  %v1709_v28 = vld [vmem:[#allocation10 + $0x120] ss:$16 sps:$4 sm:$0xff]  }
  0x63   :  { %1266 = vmatpush1.bf16.msra.mxu1 %v1646_v49  ;;  %1226 = vmatprep.subr.bf16.mxu0 %v1651_v50  ;;  %v1714_v27 = vld [vmem:[#allocation10 + $0x324] ss:$16 sps:$4 sm:$0xff]   ;;  %v1712_v29 = vld [vmem:[#allocation10 + $0x320] ss:$16 sps:$4 sm:$0xff]   ;;  %v2014_v49 = vsub.s32 1, %v397_v45  ;;  %v2016_v50 = vsub.s32 3, %v397_v45 }
  0x64   :  { %1267 = vmatprep.subr.bf16.mxu1 %v1654_v51  ;;  %v1717_v30 = vld [vmem:[#allocation10 + $0x104] ss:$16 sps:$4 sm:$0xff]   ;;  %v1715_v32 = vld [vmem:[#allocation10 + $0x100] ss:$16 sps:$4 sm:$0xff]   ;;  %v1771_v45 = vld [vmem:[#allocation10 + $0x1ec] ss:$16 sps:$4 sm:$0xff]  }
  0x65   :  { %v1720_v31 = vld [vmem:[#allocation10 + $0x304] ss:$16 sps:$4 sm:$0xff]   ;;  %v1718_v33 = vld [vmem:[#allocation10 + $0x300] ss:$16 sps:$4 sm:$0xff]  }
  0x66   :  { %1227 = vmatpush1.bf16.msra.mxu0 %v1649_v52  ;;  %v394_v48 = vld [vmem:[%s2051_s4] sm:$0xf] }
  0x67   :  { %1268 = vmatpush1.bf16.msra.mxu1 %v1652_v53  ;;  %1228 = vmatprep.subr.bf16.mxu0 %v1657_v54  ;;  %v399_v51 = vrot.slane %v394_v48, %v2007_v46  ;;  %v407_v52 = vrot.slane %v394_v48, %v2009_v47 }
  0x68   :  { %1269 = vmatprep.subr.bf16.mxu1 %v1660_v55 }
  0x6a   :  { %1229 = vmatpush1.bf16.msra.mxu0 %v1655_v56 }
  0x6b   :  { %1270 = vmatpush1.bf16.msra.mxu1 %v1658_v57  ;;  %1230 = vmatprep.subr.bf16.mxu0 %v1663_v58  ;;  %v403_v57 = vrot.slane %v394_v48, %v2014_v49  ;;  %v411_v58 = vrot.slane %v394_v48, %v2016_v50  ;;  %v1774_v48 = vld [vmem:[#allocation10 + $0x3ec] ss:$16 sps:$4 sm:$0xff]  }
  0x6c   :  { %1271 = vmatprep.subr.bf16.mxu1 %v1666_v59 }
  0x6e   :  { %1231 = vmatpush1.bf16.msra.mxu0 %v1661_v60 }
  0x6f   :  { %1272 = vmatpush1.bf16.msra.mxu1 %v1664_v61  ;;  %1232 = vmatprep.subr.bf16.mxu0 %v1669_v62 }
  0x70   :  { %1273 = vmatprep.subr.bf16.mxu1 %v1672_v63 }
  0x72   :  { %1233 = vmatpush1.bf16.msra.mxu0 %v1667_v0 }
  0x73   :  { %1274 = vmatpush1.bf16.msra.mxu1 %v1670_v1  ;;  %1234 = vmatprep.subr.bf16.mxu0 %v1675_v2 }
  0x74   :  { %1275 = vmatprep.subr.bf16.mxu1 %v1678_v3 }
  0x76   :  { %1235 = vmatpush2.bf16.msra.mxu0 %v1673_v4 }
  0x77   :  { %1276 = vmatpush2.bf16.msra.mxu1 %v1676_v5  ;;  %1236 = vmatprep.subr.bf16.mxu0 %v1681_v6 }
  0x78   :  { %1277 = vmatprep.subr.bf16.mxu1 %v1684_v7 }
  0x7a   :  { %1237 = vmatpush2.bf16.msra.mxu0 %v1679_v8 }
  0x7b   :  { %1278 = vmatpush2.bf16.msra.mxu1 %v1682_v9  ;;  %1238 = vmatprep.subr.bf16.mxu0 %v1687_v10 }
  0x7c   :  { %1279 = vmatprep.subr.bf16.mxu1 %v1690_v11 }
  0x7e   :  { %1239 = vmatpush2.bf16.msra.mxu0 %v1685_v12 }
  0x7f   :  { %1280 = vmatpush2.bf16.msra.mxu1 %v1688_v13  ;;  %1240 = vmatprep.subr.bf16.mxu0 %v1693_v14  ;;  %v1721_v13 = vld [vmem:[#allocation10 + $0xe8] ss:$16 sps:$4 sm:$0xff]  }
  0x80   :  { %1281 = vmatprep.subr.bf16.mxu1 %v1696_v15  ;;  %v1724_v14 = vld [vmem:[#allocation10 + $0x2e8] ss:$16 sps:$4 sm:$0xff]  }
  0x82   :  { %1241 = vmatpush2.bf16.msra.mxu0 %v1691_v16 }
  0x83   :  { %1282 = vmatpush2.bf16.msra.mxu1 %v1694_v17  ;;  %1242 = vmatprep.subr.bf16.mxu0 %v1699_v18  ;;  %v1729_v17 = vld [vmem:[#allocation10 + $0xcc] ss:$16 sps:$4 sm:$0xff]  }
  0x84   :  { %1283 = vmatprep.subr.bf16.mxu1 %v1702_v19  ;;  %v1732_v18 = vld [vmem:[#allocation10 + $0x2cc] ss:$16 sps:$4 sm:$0xff]   ;;  %v1727_v19 = vld [vmem:[#allocation10 + $0xc8] ss:$16 sps:$4 sm:$0xff]  }
  0x86   :  { %1243 = vmatpush2.bf16.msra.mxu0 %v1697_v20  ;;  %v1730_v20 = vld [vmem:[#allocation10 + $0x2c8] ss:$16 sps:$4 sm:$0xff]  }
  0x87   :  { %1284 = vmatpush2.bf16.msra.mxu1 %v1700_v21  ;;  %1244 = vmatprep.subr.bf16.mxu0 %v1705_v22  ;;  %v1735_v21 = vld [vmem:[#allocation10 + $0xac] ss:$16 sps:$4 sm:$0xff]  }
  0x88   :  { %1285 = vmatprep.subr.bf16.mxu1 %v1708_v23  ;;  %v1738_v22 = vld [vmem:[#allocation10 + $0x2ac] ss:$16 sps:$4 sm:$0xff]   ;;  %v1733_v23 = vld [vmem:[#allocation10 + $0xa8] ss:$16 sps:$4 sm:$0xff]  }
  0x8a   :  { %1245 = vmatpush2.bf16.msra.mxu0 %v1703_v24  ;;  %v1736_v24 = vld [vmem:[#allocation10 + $0x2a8] ss:$16 sps:$4 sm:$0xff]  }
  0x8b   :  { %1286 = vmatpush2.bf16.msra.mxu1 %v1706_v25  ;;  %1246 = vmatprep.subr.bf16.mxu0 %v1711_v26  ;;  %v1741_v25 = vld [vmem:[#allocation10 + $0x8c] ss:$16 sps:$4 sm:$0xff]  }
  0x8c   :  { %1287 = vmatprep.subr.bf16.mxu1 %v1714_v27  ;;  %v1744_v26 = vld [vmem:[#allocation10 + $0x28c] ss:$16 sps:$4 sm:$0xff]   ;;  %v1739_v27 = vld [vmem:[#allocation10 + $0x88] ss:$16 sps:$4 sm:$0xff]  }
  0x8e   :  { %1247 = vmatpush2.bf16.msra.mxu0 %v1709_v28  ;;  %v1742_v28 = vld [vmem:[#allocation10 + $0x288] ss:$16 sps:$4 sm:$0xff]  }
  0x8f   :  { %1288 = vmatpush2.bf16.msra.mxu1 %v1712_v29  ;;  %1248 = vmatprep.subr.bf16.mxu0 %v1717_v30  ;;  %v1747_v29 = vld [vmem:[#allocation10 + $0x6c] ss:$16 sps:$4 sm:$0xff]  }
  0x90   :  { %1289 = vmatprep.subr.bf16.mxu1 %v1720_v31  ;;  %v1750_v30 = vld [vmem:[#allocation10 + $0x26c] ss:$16 sps:$4 sm:$0xff]   ;;  %v1745_v31 = vld [vmem:[#allocation10 + $0x68] ss:$16 sps:$4 sm:$0xff]  }
  0x92   :  { %1249 = vmatpush2.bf16.msra.mxu0 %v1715_v32  ;;  %v1748_v32 = vld [vmem:[#allocation10 + $0x268] ss:$16 sps:$4 sm:$0xff]  }
  0x93   :  { %1290 = vmatpush2.bf16.msra.mxu1 %v1718_v33  ;;  %1300 = vmatprep.subr.bf16.mxu0 %v1723_v34  ;;  %v1753_v33 = vld [vmem:[#allocation10 + $0x4c] ss:$16 sps:$4 sm:$0xff]  }
  0x94   :  { %1341 = vmatprep.subr.bf16.mxu1 %v1726_v35  ;;  %v1756_v34 = vld [vmem:[#allocation10 + $0x24c] ss:$16 sps:$4 sm:$0xff]   ;;  %v1751_v35 = vld [vmem:[#allocation10 + $0x48] ss:$16 sps:$4 sm:$0xff]  }
 0x105   :  { %v178_v36 = vpop.f32.mrf.mxu0 }
 0x106   :  { %v219_v37 = vpop.f32.mrf.mxu1 }
 0x107   :  { %v180_v38 = vpop.f32.mrf.mxu0 }
 0x108   :  { %v221_v39 = vpop.f32.mrf.mxu1 }
 0x109   :  { %v182_v41 = vpop.f32.mrf.mxu0 }
 0x10a   :  { %v223_v42 = vpop.f32.mrf.mxu1  ;;  %v1765_v41 = vld [vmem:[#allocation10 + $0xc] ss:$16 sps:$4 sm:$0xff]  }
 0x10b   :  { %v183_v43 = vpop.f32.mrf.mxu0  ;;  %v1768_v42 = vld [vmem:[#allocation10 + $0x20c] ss:$16 sps:$4 sm:$0xff]  }
 0x10c   :  { %v224_v44 = vpop.f32.mrf.mxu1  ;;  %v1763_v43 = vld [vmem:[#allocation10 + $0x8] ss:$16 sps:$4 sm:$0xff]  }
 0x10d   :  { %v1766_v44 = vld [vmem:[#allocation10 + $0x208] ss:$16 sps:$4 sm:$0xff]  }
 0x115   :  { %v346_v53 = vpop.f32.mrf.mxu0 }
 0x116   :  { %v387_v54 = vpop.f32.mrf.mxu1  ;;  %v347_v55 = vadd.f32 %v346_v53, %v178_v36  ;;  %v1754_v36 = vld [vmem:[#allocation10 + $0x248] ss:$16 sps:$4 sm:$0xff]   ;;  %v1777_v53 = vld [vmem:[#allocation10 + $0x1cc] ss:$16 sps:$4 sm:$0xff]  }
 0x117   :  { %v388_v56 = vadd.f32 %v387_v54, %v219_v37  ;;  %v348_v59 = vpop.f32.mrf.mxu0  ;;  %v1759_v37 = vld [vmem:[#allocation10 + $0x2c] ss:$16 sps:$4 sm:$0xff]  }
 0x118   :  { %v389_v60 = vpop.f32.mrf.mxu1  ;;  %v416_v61 = vadd.f32 %v399_v51, %v347_v55  ;;  %v349_v63 = vadd.f32 %v348_v59, %v180_v38  ;;  %v1762_v38 = vld [vmem:[#allocation10 + $0x22c] ss:$16 sps:$4 sm:$0xff]   ;;  %v1769_v51 = vld [vmem:[#allocation10 + $0x1e8] ss:$16 sps:$4 sm:$0xff]  }
 0x119   :  { %v418_v62 = vadd.f32 %v407_v52, %v388_v56  ;;  %v390_v0 = vadd.f32 %v389_v60, %v221_v39  ;;  %v350_v1 = vpop.f32.mrf.mxu0  ;;  %v1757_v39 = vld [vmem:[#allocation10 + $0x28] ss:$16 sps:$4 sm:$0xff]   ;;  %v1780_v54 = vld [vmem:[#allocation10 + $0x3cc] ss:$16 sps:$4 sm:$0xff]  }
 0x11a   :  { %v391_v2 = vpop.f32.mrf.mxu1  ;;  %v417_v3 = vadd.f32 %v403_v57, %v349_v63  ;;  %v420_v5 = vmax.f32 %v416_v61, 0.0  ;;  %v1772_v52 = vld [vmem:[#allocation10 + $0x3e8] ss:$16 sps:$4 sm:$0xff]   ;;  %v1783_v57 = vld [vmem:[#allocation10 + $0x1ac] ss:$16 sps:$4 sm:$0xff]  }
 0x11b   :  { %v419_v4 = vadd.f32 %v411_v58, %v390_v0  ;;  %v422_v6 = vmax.f32 %v418_v62, 0.0  ;;  %v351_v7 = vpop.f32.mrf.mxu0  ;;  %v1775_v55 = vld [vmem:[#allocation10 + $0x1c8] ss:$16 sps:$4 sm:$0xff]   ;;  %v1786_v58 = vld [vmem:[#allocation10 + $0x3ac] ss:$16 sps:$4 sm:$0xff]  }
 0x11c   :  { %v392_v8 = vpop.f32.mrf.mxu1  ;;  %v421_v9 = vmax.f32 %v417_v3, 0.0  ;;  %v2022_v15 = vpack.c.bf16 %v420_v5, %v420_v5  ;;  %v1778_v56 = vld [vmem:[#allocation10 + $0x3c8] ss:$16 sps:$4 sm:$0xff]   ;;  %v1789_v61 = vld [vmem:[#allocation10 + $0x18c] ss:$16 sps:$4 sm:$0xff]  }
 0x11d   :  { %v423_v10 = vmax.f32 %v419_v4, 0.0  ;;  %v2024_v16 = vpack.c.bf16 %v422_v6, %v422_v6  ;;  %v1781_v59 = vld [vmem:[#allocation10 + $0x1a8] ss:$16 sps:$4 sm:$0xff]   ;;  %v1792_v62 = vld [vmem:[#allocation10 + $0x38c] ss:$16 sps:$4 sm:$0xff]  }
 0x11e   :  { %v425_v11 = vpack.c.bf16 %v421_v9, %v421_v9  ;;  %v1784_v60 = vld [vmem:[#allocation10 + $0x3a8] ss:$16 sps:$4 sm:$0xff]   ;;  %v1795_v1 = vld [vmem:[#allocation10 + $0x16c] ss:$16 sps:$4 sm:$0xff]  }
 0x11f   :  { %v427_v12 = vpack.c.bf16 %v423_v10, %v423_v10  ;;  %v1787_v63 = vld [vmem:[#allocation10 + $0x188] ss:$16 sps:$4 sm:$0xff]   ;;  %v1798_v2 = vld [vmem:[#allocation10 + $0x36c] ss:$16 sps:$4 sm:$0xff]  }
 0x120   :  { %1250 = vmatprep.mubr.bf16.mxu0 %v425_v11  ;;  %v1790_v0 = vld [vmem:[#allocation10 + $0x388] ss:$16 sps:$4 sm:$0xff]   ;;  %v1801_v5 = vld [vmem:[#allocation10 + $0x14c] ss:$16 sps:$4 sm:$0xff]  }
 0x121   :  { %1291 = vmatprep.mubr.bf16.mxu1 %v427_v12  ;;  %1251 = vmatmul.mubr.bf16.vlgmr.msra.gmra.mxu0 %v2022_v15  ;;  %v1793_v3 = vld [vmem:[#allocation10 + $0x168] ss:$16 sps:$4 sm:$0xff]   ;;  %v1804_v6 = vld [vmem:[#allocation10 + $0x34c] ss:$16 sps:$4 sm:$0xff]  }
 0x122   :  { %1292 = vmatmul.mubr.bf16.vlgmr.msra.gmra.mxu1 %v2024_v16  ;;  %1301 = vmatpush1.bf16.msra.mxu0 %v1721_v13  ;;  %v1796_v4 = vld [vmem:[#allocation10 + $0x368] ss:$16 sps:$4 sm:$0xff]   ;;  %v1807_v9 = vld [vmem:[#allocation10 + $0x12c] ss:$16 sps:$4 sm:$0xff]  }
 0x123   :  { %1342 = vmatpush1.bf16.msra.mxu1 %v1724_v14  ;;  %1332 = vmatprep.mubr.bf16.mxu0 %v425_v11  ;;  %v1799_v7 = vld [vmem:[#allocation10 + $0x148] ss:$16 sps:$4 sm:$0xff]   ;;  %v1810_v10 = vld [vmem:[#allocation10 + $0x32c] ss:$16 sps:$4 sm:$0xff]  }
 0x124   :  { %1373 = vmatprep.mubr.bf16.mxu1 %v427_v12  ;;  %1302 = vmatprep.subr.bf16.mxu0 %v1729_v17  ;;  %v1802_v8 = vld [vmem:[#allocation10 + $0x348] ss:$16 sps:$4 sm:$0xff]   ;;  %v1813_v13 = vld [vmem:[#allocation10 + $0x10c] ss:$16 sps:$4 sm:$0xff]  }
 0x125   :  { %1343 = vmatprep.subr.bf16.mxu1 %v1732_v18  ;;  %v1805_v11 = vld [vmem:[#allocation10 + $0x128] ss:$16 sps:$4 sm:$0xff]   ;;  %v1816_v14 = vld [vmem:[#allocation10 + $0x30c] ss:$16 sps:$4 sm:$0xff]  }
 0x126   :  { %1303 = vmatpush1.bf16.msra.mxu0 %v1727_v19  ;;  %v1808_v12 = vld [vmem:[#allocation10 + $0x328] ss:$16 sps:$4 sm:$0xff]  }
 0x127   :  { %1344 = vmatpush1.bf16.msra.mxu1 %v1730_v20  ;;  %1304 = vmatprep.subr.bf16.mxu0 %v1735_v21  ;;  %v1811_v17 = vld [vmem:[#allocation10 + $0x108] ss:$16 sps:$4 sm:$0xff]  }
 0x128   :  { %1345 = vmatprep.subr.bf16.mxu1 %v1738_v22  ;;  %v1814_v18 = vld [vmem:[#allocation10 + $0x308] ss:$16 sps:$4 sm:$0xff]  }
 0x12a   :  { %1305 = vmatpush1.bf16.msra.mxu0 %v1733_v23 }
 0x12b   :  { %1346 = vmatpush1.bf16.msra.mxu1 %v1736_v24  ;;  %1306 = vmatprep.subr.bf16.mxu0 %v1741_v25 }
 0x12c   :  { %1347 = vmatprep.subr.bf16.mxu1 %v1744_v26 }
 0x12e   :  { %1307 = vmatpush1.bf16.msra.mxu0 %v1739_v27  ;;  %v556_v27 = vld [vmem:[%s2053_s6] sm:$0xf] }
 0x12f   :  { %1348 = vmatpush1.bf16.msra.mxu1 %v1742_v28  ;;  %1308 = vmatprep.subr.bf16.mxu0 %v1747_v29  ;;  %v565_v28 = vrot.slane %v556_v27, %v2014_v49  ;;  %v561_v29 = vrot.slane %v556_v27, %v2007_v46 }
 0x130   :  { %1349 = vmatprep.subr.bf16.mxu1 %v1750_v30 }
 0x132   :  { %1309 = vmatpush1.bf16.msra.mxu0 %v1745_v31 }
 0x133   :  { %1350 = vmatpush1.bf16.msra.mxu1 %v1748_v32  ;;  %1310 = vmatprep.subr.bf16.mxu0 %v1753_v33  ;;  %v569_v32 = vrot.slane %v556_v27, %v2009_v47  ;;  %v1386_v33 = vld [vmem:[%s2054_s7] sm:$0xf] }
 0x134   :  { %1351 = vmatprep.subr.bf16.mxu1 %v1756_v34 }
 0x136   :  { %1311 = vmatpush1.bf16.msra.mxu0 %v1751_v35  ;;  %v1395_v35 = vrot.slane %v1386_v33, %v2014_v49 }
 0x137   :  { %1352 = vmatpush1.bf16.msra.mxu1 %v1754_v36  ;;  %1312 = vmatprep.subr.bf16.mxu0 %v1759_v37  ;;  %v573_v36 = vrot.slane %v556_v27, %v2016_v50 }
 0x138   :  { %1353 = vmatprep.subr.bf16.mxu1 %v1762_v38 }
 0x13a   :  { %1313 = vmatpush1.bf16.msra.mxu0 %v1757_v39 }
 0x13b   :  { %1354 = vmatpush1.bf16.msra.mxu1 %v1760_v40  ;;  %1314 = vmatprep.subr.bf16.mxu0 %v1765_v41  ;;  %v1391_v40 = vrot.slane %v1386_v33, %v2007_v46 }
 0x13c   :  { %1355 = vmatprep.subr.bf16.mxu1 %v1768_v42 }
 0x13e   :  { %1315 = vmatpush1.bf16.msra.mxu0 %v1763_v43 }
 0x13f   :  { %1356 = vmatpush1.bf16.msra.mxu1 %v1766_v44  ;;  %1316 = vmatprep.subr.bf16.mxu0 %v1771_v45 }
 0x140   :  { %1357 = vmatprep.subr.bf16.mxu1 %v1774_v48  ;;  %v1399_v48 = vrot.slane %v1386_v33, %v2009_v47 }
 0x142   :  { %1317 = vmatpush2.bf16.msra.mxu0 %v1769_v51 }
 0x143   :  { %1358 = vmatpush2.bf16.msra.mxu1 %v1772_v52  ;;  %1318 = vmatprep.subr.bf16.mxu0 %v1777_v53 }
 0x144   :  { %1359 = vmatprep.subr.bf16.mxu1 %v1780_v54 }
 0x146   :  { %1319 = vmatpush2.bf16.msra.mxu0 %v1775_v55 }
 0x147   :  { %1360 = vmatpush2.bf16.msra.mxu1 %v1778_v56  ;;  %1320 = vmatprep.subr.bf16.mxu0 %v1783_v57  ;;  %v1403_v56 = vrot.slane %v1386_v33, %v2016_v50 }
 0x148   :  { %1361 = vmatprep.subr.bf16.mxu1 %v1786_v58 }
 0x14a   :  { %1321 = vmatpush2.bf16.msra.mxu0 %v1781_v59 }
 0x14b   :  { %1362 = vmatpush2.bf16.msra.mxu1 %v1784_v60  ;;  %1322 = vmatprep.subr.bf16.mxu0 %v1789_v61 }
 0x14c   :  { %1363 = vmatprep.subr.bf16.mxu1 %v1792_v62 }
 0x14e   :  { %1323 = vmatpush2.bf16.msra.mxu0 %v1787_v63 }
 0x14f   :  { %1364 = vmatpush2.bf16.msra.mxu1 %v1790_v0  ;;  %1324 = vmatprep.subr.bf16.mxu0 %v1795_v1  ;;  %v1590_v0 = vld [vmem:[#allocation2] ss:$0 sm:$0xff] }
 0x150   :  { %1365 = vmatprep.subr.bf16.mxu1 %v1798_v2 }
 0x152   :  { %1325 = vmatpush2.bf16.msra.mxu0 %v1793_v3 }
 0x153   :  { %1366 = vmatpush2.bf16.msra.mxu1 %v1796_v4  ;;  %1326 = vmatprep.subr.bf16.mxu0 %v1801_v5 }
 0x154   :  { %1367 = vmatprep.subr.bf16.mxu1 %v1804_v6 }
 0x156   :  { %1327 = vmatpush2.bf16.msra.mxu0 %v1799_v7 }
 0x157   :  { %1368 = vmatpush2.bf16.msra.mxu1 %v1802_v8  ;;  %1328 = vmatprep.subr.bf16.mxu0 %v1807_v9 }
 0x158   :  { %1369 = vmatprep.subr.bf16.mxu1 %v1810_v10 }
 0x15a   :  { %1329 = vmatpush2.bf16.msra.mxu0 %v1805_v11 }
 0x15b   :  { %1370 = vmatpush2.bf16.msra.mxu1 %v1808_v12  ;;  %1330 = vmatprep.subr.bf16.mxu0 %v1813_v13 }
 0x15c   :  { %1371 = vmatprep.subr.bf16.mxu1 %v1816_v14 }
 0x15e   :  { %1331 = vmatpush2.bf16.msra.mxu0 %v1811_v17 }
 0x15f   :  { %1372 = vmatpush2.bf16.msra.mxu1 %v1814_v18 }
 0x161   :  { %1333 = vmatmul.mubr.bf16.vlgmr.msra.gmra.mxu0 %v2022_v15 }
 0x162   :  { %1374 = vmatmul.mubr.bf16.vlgmr.msra.gmra.mxu1 %v2024_v16 }
 0x1e1   :  { %v1252_v19 = vpop.f32.mrf.mxu0 }
 0x1e2   :  { %v1293_v20 = vpop.f32.mrf.mxu1  ;;  %v1253_v15 = vadd.f32 %v1252_v19, %v561_v29 }
 0x1e3   :  { %v1254_v21 = vpop.f32.mrf.mxu0 }
 0x1e4   :  { %v1295_v22 = vpop.f32.mrf.mxu1  ;;  %v1255_v30 = vadd.f32 %v1254_v21, %v565_v28  ;;  %v1294_v16 = vadd.f32 %v1293_v20, %v1253_v15 }
 0x1e5   :  { %v1256_v23 = vpop.f32.mrf.mxu0 }
 0x1e6   :  { %v1297_v24 = vpop.f32.mrf.mxu1  ;;  %v1296_v31 = vadd.f32 %v1295_v22, %v1255_v30  ;;  %v1382_v39 = vmax.f32 %v1294_v16, 0.0 }
 0x1e7   :  { %v1257_v25 = vpop.f32.mrf.mxu0 }
 0x1e8   :  { %v1298_v26 = vpop.f32.mrf.mxu1  ;;  %v1383_v34 = vmax.f32 %v1296_v31, 0.0  ;;  %v1408_v54 = vmul.f32 %v1391_v40, %v1382_v39 }
 0x1ea   :  { %v1409_v44 = vmul.f32 %v1395_v35, %v1383_v34 }
 0x1ec   :  { %v1412_v46 = vadd.f32 %v1409_v44, %v1408_v54 }
 0x221   :  { %v1334_v37 = vpop.f32.mrf.mxu0 }
 0x222   :  { %v1375_v38 = vpop.f32.mrf.mxu1  ;;  %v1335_v41 = vadd.f32 %v1334_v37, %v569_v32 }
 0x223   :  { %v1336_v42 = vpop.f32.mrf.mxu0 }
 0x224   :  { %v1377_v43 = vpop.f32.mrf.mxu1  ;;  %v1376_v45 = vadd.f32 %v1375_v38, %v1335_v41  ;;  %v1337_v51 = vadd.f32 %v1336_v42, %v573_v36 }
 0x225   :  { %v1338_v52 = vpop.f32.mrf.mxu0 }
 0x226   :  { %v1379_v53 = vpop.f32.mrf.mxu1  ;;  %v1384_v55 = vmax.f32 %v1376_v45, 0.0  ;;  %v1378_v49 = vadd.f32 %v1377_v43, %v1337_v51 }
 0x227   :  { %v1339_v57 = vpop.f32.mrf.mxu0 }
 0x228   :  { %v1380_v58 = vpop.f32.mrf.mxu1  ;;  %v1410_v59 = vmul.f32 %v1399_v48, %v1384_v55  ;;  %v1385_v60 = vmax.f32 %v1378_v49, 0.0 }
 0x22a   :  { %v1411_v61 = vmul.f32 %v1403_v56, %v1385_v60  ;;  %v1413_v62 = vadd.f32 %v1412_v46, %v1410_v59 }
 0x22c   :  { %v1414_v63 = vadd.f32 %v1413_v62, %v1411_v61 }
 0x22e   :  { %1415 = vadd.xlane.f32.xlu0 %v1414_v63 }
 0x2b7   :  { %v1416_v1 = vpop.xlane.xlu0 %1415 }
 0x2b8   :  { %v1424_v47 = vadd.f32 %v1590_v0, %v1416_v1 }
 0x2ba   :  { %1426 = vst.msk [vmem:[%s2056_s9] sm:$0xff] %vm1425_vm3, %v1424_v47 }
 0x2bb   :  { %1431 = vsyncpa [#allocation4], 1 }
 0x2bc   :  { %1432 = vsyncpa [#allocation6], 1 }
 0x2bd   :  { %1433 = vsyncpa [#allocation9], 1 }

</bundles_post_ra>
